<compile_context>
chip_gen: v7x
topology: tpu7x:2x2x1
jax: 0.10.0
libtpu: 0.0.40
codegen_flags: <defaults>
</compile_context>

<pallas_src>
import functools

import jax
import jax.numpy as jnp
from jax.experimental import pallas as pl
from jax.experimental.pallas import tpu as pltpu


def _round_up(x, m):
    return ((x + m - 1) // m) * m


def _vmem_budget_bytes():
    """Scoped-VMEM budget derived from the actual chip (v5e/v6e: ~96MiB, v7x: ~48MiB)."""
    cap = None
    try:
        info = pltpu.get_tpu_info()
        cap = getattr(info, "vmem_capacity_bytes", None)
    except Exception:
        cap = None
    if not cap:
        cap = 64 * 1024 * 1024
    return min(int(cap) * 3 // 4, 100 * 1024 * 1024)


def _spec(shape, index_map, buffers=None):
    """BlockSpec with optional pipeline_mode=pl.Buffered(n); degrades gracefully."""
    if buffers is None:
        return pl.BlockSpec(shape, index_map)
    try:
        return pl.BlockSpec(shape, index_map, pipeline_mode=pl.Buffered(buffers))
    except Exception:
        return pl.BlockSpec(shape, index_map)


# -----------------------------------------------------------------------------
# In-kernel helpers
# -----------------------------------------------------------------------------
def _standardize_cols(x, n_valid_rows):
    """Column-wise (x - mean) / std over the first n_valid_rows rows (ddof=1).

    Rows >= n_valid_rows must be zero on input and are zero on output.
    Zero-variance (lane-padding) columns map to zero instead of NaN.
    Uses rsqrt (EUP slot) instead of sqrt + divide.
    """
    nv = jnp.float32(n_valid_rows)
    row_ids = jax.lax.broadcasted_iota(jnp.int32, x.shape, 0)
    row_mask = (row_ids < n_valid_rows).astype(jnp.float32)
    mean = jnp.sum(x, axis=0, keepdims=True) / nv
    centered = (x - mean) * row_mask
    denom = jnp.maximum(nv - 1.0, 1.0)          # guard n_valid_rows == 1
    var = jnp.sum(centered * centered, axis=0, keepdims=True) / denom
    inv_std = jnp.where(var > 0.0, jax.lax.rsqrt(var), 0.0)
    return centered * inv_std


# -----------------------------------------------------------------------------
# Kernel 1: fused text-projection head (synthetic encoder), bf16 MXU
# -----------------------------------------------------------------------------
def _proj_kernel(x_ref, w_ref, o_ref):
    o_ref[...] = jnp.dot(x_ref[...], w_ref[...],
                         preferred_element_type=jnp.float32)


def text_project(cls_embeds, w_proj):
    """Synthetic text-encoder head: single bf16 Pallas matmul for ALL texts."""
    b, e = cls_embeds.shape
    d = w_proj.shape[1]
    ep = _round_up(e, 128)
    dp = _round_up(d, 128)
    bp = _round_up(b, 8) if b <= 256 else _round_up(b, 256)
    tr = bp if bp <= 256 else 256
    budget = _vmem_budget_bytes()

    x_p = (jnp.zeros((bp, ep), jnp.bfloat16)
           .at[:b, :e].set(cls_embeds.astype(jnp.bfloat16)))
    w_p = (jnp.zeros((ep, dp), jnp.bfloat16)
           .at[:e, :d].set(w_proj.astype(jnp.bfloat16)))

    out = pl.pallas_call(
        _proj_kernel,
        out_shape=jax.ShapeDtypeStruct((bp, dp), jnp.float32),
        grid=(bp // tr,),
        in_specs=[_spec((tr, ep), lambda i: (i, 0)),
                  _spec((ep, dp), lambda i: (0, 0), buffers=1)],
        out_specs=pl.BlockSpec((tr, dp), lambda i: (i, 0)),
        compiler_params=pltpu.CompilerParams(
            dimension_semantics=("parallel",),
            vmem_limit_bytes=budget),
        cost_estimate=pl.CostEstimate(
            flops=2 * bp * ep * dp, transcendentals=0,
            bytes_accessed=2 * (bp * ep + ep * dp) + 4 * bp * dp),
    )(x_p, w_p)
    return out[:b, :d]


# -----------------------------------------------------------------------------
# Kernel 2a: preprocess — standardize, cast bf16, transpose labels
# -----------------------------------------------------------------------------
def _preprocess_kernel(x_ref, lab_ref, xo_ref, labt_ref, *,
                       num_nodes, num_classes, if_norm):
    x = x_ref[...]
    lab = lab_ref[...]
    if if_norm:
        x = _standardize_cols(x, num_nodes)
        lab = _standardize_cols(lab, num_classes)
    xo_ref[...] = x.astype(xo_ref.dtype)
    labt_ref[...] = lab.T.astype(labt_ref.dtype)   # (Dp, Cp) — MXU-friendly


# -----------------------------------------------------------------------------
# Kernel 2b/2c: R rounds of graph propagation  x <- adj_normed @ x
# -----------------------------------------------------------------------------
def _prop_resident_kernel(adj_ref, x_ref, o_ref, xa_ref, *, num_rounds):
    # Whole graph state resident in VMEM; ping-pong between xa_ref and the
    # output ref so round (num_rounds-1) lands in o_ref and HBM is written once.
    bufs = (o_ref, xa_ref)
    src_ref = x_ref
    for r in range(num_rounds):
        dst_ref = bufs[(num_rounds - 1 - r) % 2]
        dst_ref[...] = jnp.dot(adj_ref[...], src_ref[...],
                               preferred_element_type=jnp.float32
                               ).astype(dst_ref.dtype)
        src_ref = dst_ref


def _prop_stream_kernel(adj_ref, x_ref, o_ref, xa_ref, xb_ref, *, tile_m):
    r = pl.program_id(0)   # round    (serial)
    i = pl.program_id(1)   # row tile (serial: shares ping-pong scratch)

    @pl.when(jnp.logical_and(r == 0, i == 0))
    def _():
        xa_ref[...] = x_ref[...]          # already normalized + bf16

    adj_slab = adj_ref[...]               # (tm, Mp) bf16, pipelined slab

    def one_round(src_ref, dst_ref):
        acc = jnp.dot(adj_slab, src_ref[...],
                      preferred_element_type=jnp.float32)     # (tm, Dp) f32
        out_bf = acc.astype(dst_ref.dtype)
        row0 = pl.multiple_of(i * tile_m, tile_m)
        dst_ref[pl.ds(row0, tile_m), :] = out_bf
        o_ref[...] = out_bf               # bf16 writeback; last round wins

    @pl.when(r % 2 == 0)
    def _():
        one_round(xa_ref, xb_ref)

    @pl.when(r % 2 == 1)
    def _():
        one_round(xb_ref, xa_ref)


# -----------------------------------------------------------------------------
# Kernel 3: contrastive logits + per-tile cross-entropy partial sums
# -----------------------------------------------------------------------------
def _logits_loss_kernel(x_ref, labt_ref, y_ref, logits_ref, part_ref, *,
                        num_classes):
    logits = jnp.dot(x_ref[...], labt_ref[...],
                     preferred_element_type=jnp.float32)      # (tm, Cp) f32
    logits_ref[...] = logits                                  # lane-dense store

    col_ids = jax.lax.broadcasted_iota(jnp.int32, logits.shape, 1)
    masked = jnp.where(col_ids < num_classes, logits, jnp.float32(-1e30))
    row_max = jnp.max(masked, axis=1, keepdims=True)
    lse = row_max + jnp.log(
        jnp.sum(jnp.exp(masked - row_max), axis=1, keepdims=True))

    y = y_ref[...]                                            # (tm, 1) int32
    picked = jnp.sum(jnp.where(col_ids == y, logits, 0.0),
                     axis=1, keepdims=True)
    row_valid = (y >= 0).astype(jnp.float32)                  # -1 => virtual/pad
    part = jnp.sum((lse - picked) * row_valid)
    part_ref[...] = jnp.zeros(part_ref.shape, jnp.float32) + part


# -----------------------------------------------------------------------------
# Wrapper
# -----------------------------------------------------------------------------
def zerog_forward(adj_normed, node_embeds, label_embeds, labels, *,
                  num_rounds, if_norm, force_stream_adj=False):
    """Fused ZeroG graph forward. Returns (logits (N, C) f32, loss scalar)."""
    assert num_rounds >= 1
    m, d = node_embeds.shape
    c = label_embeds.shape[0]
    n = m - 1                                    # labeled (non-virtual) nodes

    mp = _round_up(m, 8) if m <= 256 else _round_up(m, 256)
    dp = _round_up(d, 128)
    cp = _round_up(c, 128)
    tm = mp if mp <= 256 else 256
    n_tiles = mp // tm

    budget = _vmem_budget_bytes()

    # -- host-side padding glue (built directly in kernel dtypes) ------------
    x_p = jnp.zeros((mp, dp), jnp.float32).at[:m, :d].set(node_embeds)
    lab_p = jnp.zeros((cp, dp), jnp.float32).at[:c, :d].set(label_embeds)
    adj_p = (jnp.zeros((mp, mp), jnp.bfloat16)
             .at[:m, :m].set(adj_normed.astype(jnp.bfloat16)))
    y_p = jnp.full((mp, 1), -1, jnp.int32).at[:n, 0].set(labels.astype(jnp.int32))

    # -- preprocess: standardize + bf16 + transposed labels (one launch) -----
    pre_kernel = functools.partial(_preprocess_kernel, num_nodes=m,
                                   num_classes=c, if_norm=if_norm)
    x_bf, lab_t = pl.pallas_call(
        pre_kernel,
        out_shape=(jax.ShapeDtypeStruct((mp, dp), jnp.bfloat16),
                   jax.ShapeDtypeStruct((dp, cp), jnp.bfloat16)),
        grid=(1,),
        in_specs=[_spec((mp, dp), lambda i: (0, 0), buffers=1),
                  _spec((cp, dp), lambda i: (0, 0), buffers=1)],
        out_specs=(pl.BlockSpec((mp, dp), lambda i: (0, 0)),
                   pl.BlockSpec((dp, cp), lambda i: (0, 0))),
        compiler_params=pltpu.CompilerParams(
            dimension_semantics=("arbitrary",),
            vmem_limit_bytes=budget),
    )(x_p, lab_p)

    # -- propagation: adj-resident fast path vs streamed slabs ---------------
    x_state = mp * dp * 2                          # one bf16 copy of the state
    resident_bytes = mp * mp * 2 + 3 * x_state     # adj + x_in + out + scratch
    adj_resident = ((not force_stream_adj)
                    and (resident_bytes + (4 << 20) <= budget))

    if adj_resident:
        prop_kernel = functools.partial(_prop_resident_kernel,
                                        num_rounds=num_rounds)
        x_prop = pl.pallas_call(
            prop_kernel,
            out_shape=jax.ShapeDtypeStruct((mp, dp), jnp.bfloat16),
            grid=(1,),
            in_specs=[_spec((mp, mp), lambda i: (0, 0), buffers=1),
                      _spec((mp, dp), lambda i: (0, 0), buffers=1)],
            out_specs=pl.BlockSpec((mp, dp), lambda i: (0, 0)),
            scratch_shapes=[pltpu.VMEM((mp, dp), jnp.bfloat16)],
            compiler_params=pltpu.CompilerParams(
                dimension_semantics=("arbitrary",),
                vmem_limit_bytes=budget),
            cost_estimate=pl.CostEstimate(
                flops=2 * num_rounds * mp * mp * dp, transcendentals=0,
                bytes_accessed=mp * mp * 2 + 2 * mp * dp * 2),
        )(adj_p, x_bf)
    else:
        adj_bufs = 3 if (3 * tm * mp * 2 + 4 * mp * dp * 2 + (4 << 20)
                         <= budget) else 2
        prop_kernel = functools.partial(_prop_stream_kernel, tile_m=tm)
        x_prop = pl.pallas_call(
            prop_kernel,
            out_shape=jax.ShapeDtypeStruct((mp, dp), jnp.bfloat16),
            grid=(num_rounds, n_tiles),
            in_specs=[_spec((tm, mp), lambda r, i: (i, 0), buffers=adj_bufs),
                      _spec((mp, dp), lambda r, i: (0, 0), buffers=1)],
            out_specs=pl.BlockSpec((tm, dp), lambda r, i: (i, 0)),
            scratch_shapes=[pltpu.VMEM((mp, dp), jnp.bfloat16),
                            pltpu.VMEM((mp, dp), jnp.bfloat16)],
            compiler_params=pltpu.CompilerParams(
                dimension_semantics=("arbitrary", "arbitrary"),
                vmem_limit_bytes=budget),
            cost_estimate=pl.CostEstimate(
                flops=2 * num_rounds * mp * mp * dp, transcendentals=0,
                bytes_accessed=num_rounds * mp * mp * 2
                + (num_rounds + 1) * mp * dp * 2),
        )(adj_p, x_bf)

    # -- logits + CE partial sums (row tiles independent => "parallel") ------
    ll_kernel = functools.partial(_logits_loss_kernel, num_classes=c)
    logits_p, parts = pl.pallas_call(
        ll_kernel,
        out_shape=(jax.ShapeDtypeStruct((mp, cp), jnp.float32),
                   jax.ShapeDtypeStruct((n_tiles, 8, 128), jnp.float32)),
        grid=(n_tiles,),
        in_specs=[_spec((tm, dp), lambda i: (i, 0)),
                  _spec((dp, cp), lambda i: (0, 0), buffers=1),
                  _spec((tm, 1), lambda i: (i, 0))],
        out_specs=(pl.BlockSpec((tm, cp), lambda i: (i, 0)),
                   pl.BlockSpec((1, 8, 128), lambda i: (i, 0, 0))),
        compiler_params=pltpu.CompilerParams(
            dimension_semantics=("parallel",),
            vmem_limit_bytes=budget),
        cost_estimate=pl.CostEstimate(
            flops=2 * mp * dp * cp, transcendentals=2 * mp * cp,
            bytes_accessed=mp * dp * 2 + dp * cp * 2 + mp * cp * 4),
    )(x_prop, lab_t, y_p)

    loss = jnp.sum(parts[:, 0, 0]) / jnp.float32(n)
    return logits_p[:n, :c], loss


def normalize_adj_matrix(edge_index, num_nodes):
    """Symmetric GCN normalization D^-1/2 (A + I) D^-1/2 (plain JAX glue)."""
    src, dst = edge_index[0], edge_index[1]
    adj = jnp.zeros((num_nodes, num_nodes), jnp.float32)
    adj = adj.at[src, dst].set(1.0)
    adj = adj + jnp.eye(num_nodes, dtype=jnp.float32)
    deg = jnp.sum(adj, axis=1)
    d_inv_sqrt = 1.0 / jnp.sqrt(jnp.maximum(deg, 1e-12))
    return d_inv_sqrt[:, None] * adj * d_inv_sqrt[None, :]


# -----------------------------------------------------------------------------
# Main
# -----------------------------------------------------------------------------
if __name__ == "__main__":
    key = jax.random.PRNGKey(0)
    k_emb, k_proj, k_node_tok, k_lab_tok, k_y = jax.random.split(key, 5)

    # Small synthetic shapes
    N = 6            # real graph nodes
    M = N + 1        # + virtual node
    C = 3            # number of classes / label texts
    D = 32           # hidden dim of "text embeddings"
    E = 32           # synthetic token-embedding dim
    L = 8            # token sequence length
    V = 50           # vocab size
    R = 2            # propagation rounds
    IF_NORM = True

    # --- synthetic text encoder parameters (deterministic) -------------------
    emb_table = jax.random.normal(k_emb, (V, E), jnp.float32) * 0.1
    w_proj = jax.random.normal(k_proj, (E, D), jnp.float32) * 0.1

    # --- synthetic "tokenized" inputs ----------------------------------------
    node_tokens = jax.random.randint(k_node_tok, (M, L), 0, V)
    label_tokens = jax.random.randint(k_lab_tok, (C, L), 0, V)

    node_cls = emb_table[node_tokens[:, 0]]          # (M, E)  glue: gather
    label_cls = emb_table[label_tokens[:, 0]]        # (C, E)

    # Fused single projection call for node + label texts (one launch).
    cls_all = jnp.concatenate([node_cls, label_cls], axis=0)     # (M + C, E)
    text_embeds = text_project(cls_all, w_proj)                  # (M + C, D)
    node_embeds = text_embeds[:M]
    label_embeds = text_embeds[M:]

    # --- graph structure ------------------------------------------------------
    src = jnp.arange(N, dtype=jnp.int32)
    dst = (src + 1) % N
    existing_edges = jnp.stack([jnp.concatenate([src, dst]),
                                jnp.concatenate([dst, src])], axis=0)
    virt = jnp.full((N,), N, dtype=jnp.int32)
    node_ids = jnp.arange(N, dtype=jnp.int32)
    virtual_edges = jnp.stack([jnp.concatenate([node_ids, virt]),
                               jnp.concatenate([virt, node_ids])], axis=0)
    new_edge_index = jnp.concatenate([existing_edges, virtual_edges], axis=1)
    adj_normed = normalize_adj_matrix(new_edge_index, M)   # (M, M)

    labels = jax.random.randint(k_y, (N,), 0, C).astype(jnp.int32)

    # --- fused Pallas forward (both adj-resident and adj-streaming paths) ----
    logits, cl_loss = zerog_forward(adj_normed, node_embeds, label_embeds,
                                    labels, num_rounds=R, if_norm=IF_NORM)
    logits_s, cl_loss_s = zerog_forward(adj_normed, node_embeds, label_embeds,
                                        labels, num_rounds=R, if_norm=IF_NORM,
                                        force_stream_adj=True)
    jax.block_until_ready((logits, cl_loss, logits_s, cl_loss_s))

    # --- sanity checks against pure-JAX reference -----------------------------
    ref_proj = cls_all @ w_proj
    # bf16 projection inputs -> relaxed tolerance.
    assert jnp.allclose(text_embeds, ref_proj, atol=5e-3, rtol=5e-2)

    def _ref():
        x, lab = node_embeds, label_embeds
        if IF_NORM:
            x = (x - x.mean(0)) / x.std(0, ddof=1)
            lab = (lab - lab.mean(0)) / lab.std(0, ddof=1)
        for _ in range(R):
            x = adj_normed @ x
        lg = x[:-1] @ lab.T
        lse = jax.nn.logsumexp(lg, axis=1)
        picked = lg[jnp.arange(N), labels]
        return lg, jnp.mean(lse - picked)

    ref_logits, ref_loss = _ref()
    # bf16 propagation/logits vs f32 reference -> relaxed tolerance.
    assert jnp.allclose(logits, ref_logits, atol=2e-1, rtol=1e-1)
    assert jnp.allclose(cl_loss, ref_loss, atol=2e-1, rtol=1e-1)
    # Resident-adj and streamed-adj paths must agree closely.
    assert jnp.allclose(logits_s, logits, atol=2e-2, rtol=1e-2)
    assert jnp.allclose(cl_loss_s, cl_loss, atol=2e-2, rtol=1e-2)

    print("KERNEL_OK")
</pallas_src>

<mosaic_0001>
module attributes {stable_mosaic.version = 11 : i64} {
  func.func @_proj_kernel(%arg0: i32, %arg1: memref<16x128xbf16, #tpu.memory_space<vmem>>, %arg2: memref<128x128xbf16, #tpu.memory_space<vmem>>, %arg3: memref<16x128xf32, #tpu.memory_space<vmem>>) attributes {dimension_semantics = [#tpu.dimension_semantics<parallel>], iteration_bounds = array<i64: 1>, scalar_prefetch = 0 : i64, scratch_operands = 0 : i64, tpu.core_type = #tpu.core_type<tc>, window_params = [{transform_indices = @transform_0, window_bounds = array<i64: 16, 128>}, {pipeline_mode = #tpu.pipeline_mode<synchronous>, transform_indices = @transform_1, window_bounds = array<i64: 128, 128>}, {transform_indices = @transform_2, window_bounds = array<i64: 16, 128>}]} {
    %c0 = arith.constant 0 : index
    %c0_0 = arith.constant 0 : index
    %0 = vector.load %arg1[%c0, %c0_0] : memref<16x128xbf16, #tpu.memory_space<vmem>>, vector<16x128xbf16>
    %c0_1 = arith.constant 0 : index
    %c0_2 = arith.constant 0 : index
    %1 = vector.load %arg2[%c0_1, %c0_2] : memref<128x128xbf16, #tpu.memory_space<vmem>>, vector<128x128xbf16>
    %cst = arith.constant dense<0.000000e+00> : vector<16x128xf32>
    %2 = tpu.matmul %0, %1, %cst {dimension_numbers = #tpu.dot_dimension_numbers<[1], [0], [0], [1], [0, 0, 1, 1], [], []>} : vector<16x128xbf16>, vector<128x128xbf16>, vector<16x128xf32> -> vector<16x128xf32>
    %c0_3 = arith.constant 0 : index
    %c0_4 = arith.constant 0 : index
    %3 = vector.load %arg3[%c0_3, %c0_4] : memref<16x128xf32, #tpu.memory_space<vmem>>, vector<16x128xf32>
    tpu.vector_store %arg3[%c0_3, %c0_4], %2 {strides = array<i32>} : memref<16x128xf32, #tpu.memory_space<vmem>>, vector<16x128xf32>,
    return
  }
  func.func @transform_0(%arg0: i32) -> (i32, i32) {
    %c0_i32 = arith.constant 0 : i32
    %c0_i32_0 = arith.constant 0 : i32
    return %arg0, %c0_i32 : i32, i32
  }
  func.func @transform_1(%arg0: i32) -> (i32, i32) {
    %c0_i32 = arith.constant 0 : i32
    %c0_i32_0 = arith.constant 0 : i32
    %c0_i32_1 = arith.constant 0 : i32
    return %c0_i32, %c0_i32_0 : i32, i32
  }
  func.func @transform_2(%arg0: i32) -> (i32, i32) {
    %c0_i32 = arith.constant 0 : i32
    %c0_i32_0 = arith.constant 0 : i32
    return %arg0, %c0_i32 : i32, i32
  }
}

</mosaic_0001>

<bundles_post_ra>
// kernel: tpu_custom_call.1
= control target key start
LH: loop header
LB: loop body
LE: loop exit
PB: predicated region body
PF: predicated region fallthrough
CT: control target
= control target key end

     0   :  { %7 = vsyncpa [#allocation3], 0  ;;  %s362_s0 = inlined_call_operand.hbm [shape: bf16[16,128], index: 0, kind: input, shape index: {}]   ;;  %s363_s1 = inlined_call_operand.hbm [shape: bf16[128,128], index: 1, kind: input, shape index: {}]   ;;  %s364_s2 = inlined_call_operand.hbm [shape: f32[16,128], index: 2, kind: output, shape index: {}]  }
   0x1   :  { %8 = vsyncpa [#allocation6], 0 }
   0x2   :  { %9 = vsyncpa [#allocation4], 0  ;;  %s302_s9 = smov [#allocation2]   ;;  %s230_s13 = scalar_lea.hbm %s362_s0, 128 }
   0x3   :  { %s15_s10 = sshll.u32 %s302_s9, 4  ;;  %p231_p0 = scmp.ne.s32.totalorder %s362_s0, %s230_s13  ;;  %s16_s10 = int_to_ptr.vmem [resolvable:$true] %s15_s10 }
   0x4   :  { %p234_p1 = scmp.lt.u32.totalorder %s230_s13, %s362_s0 }
   0x6   :  { %p236_p2 = pnand %p234_p1, %p231_p0 }
   0x8   :  { %239 = shalt.err (!%p236_p2)
}
   0x9   :  { %s240_s18 = scalar_lea.vmem %s16_s10, 128  ;;  %p245_p4 = scmp.lt.s32.totalorder %s16_s10, %s16_s10 }
   0xa   :  { %p241_p3 = scmp.ne.s32.totalorder %s16_s10, %s240_s18  ;;  %p246_p5 = scmp.lt.s32.totalorder %s240_s18, %s240_s18 }
   0xc   :  { %p247_p6 = por %p246_p5, %p245_p4 }
   0xe   :  { %p248_p7 = pnand %p247_p6, %p241_p3 }
  0x10   :  { %251 = shalt.err (!%p248_p7)
}
  0x11   :  { %s303_s19 = smov 64   ;;  %s304_s20 = smov 4  }
  0x12   :  { %21 = dma.hbm_to_vmem [thread:$0]  %s362_s0, 128, %s16_s10, [#allocation3], %s303_s19, %s303_s19, %s304_s20  }
  0x13   :  { %s305_s23 = smov [#allocation5]   ;;  %s252_s27 = scalar_lea.hbm %s363_s1, 1024 }
  0x14   :  { %s27_s24 = sshll.u32 %s305_s23, 4  ;;  %p253_p8 = scmp.ne.s32.totalorder %s363_s1, %s252_s27  ;;  %s28_s24 = int_to_ptr.vmem [resolvable:$true] %s27_s24 }
  0x15   :  { %p256_p9 = scmp.lt.u32.totalorder %s252_s27, %s363_s1 }
  0x17   :  { %p258_p10 = pnand %p256_p9, %p253_p8 }
  0x19   :  { %261 = shalt.err (!%p258_p10)
}
  0x1a   :  { %s262_s4 = scalar_lea.vmem %s28_s24, 1024  ;;  %p267_p12 = scmp.lt.s32.totalorder %s28_s24, %s28_s24 }
  0x1b   :  { %p263_p11 = scmp.ne.s32.totalorder %s28_s24, %s262_s4  ;;  %p268_p13 = scmp.lt.s32.totalorder %s262_s4, %s262_s4 }
  0x1d   :  { %p269_p0 = por %p268_p13, %p267_p12 }
  0x1f   :  { %p270_p1 = pnand %p269_p0, %p263_p11 }
  0x21   :  { %273 = shalt.err (!%p270_p1)
}
  0x22   :  { %33 = dma.hbm_to_vmem [thread:$0]  %s363_s1, 1024, %s28_s24, [#allocation6], %s303_s19, %s303_s19, %s304_s20  }
  0x23   :  { %296 = dma.done.wait [#allocation3], 128  }
  0x24   :  { %297 = vsyncadd [#allocation3], 4294967168 }
  0x25   :  { %298 = dma.done.wait [#allocation6], 1024  }
  0x26   :  { %299 = vsyncadd [#allocation6], 4294966272  ;;  %v306_v0 = vmov 0.0   ;;  %vm307_vm0 = vmmov 0   ;;  %v221_v1 = vld [vmem:[#allocation5] sm:$0xff]   ;;  %v222_v2 = vld [vmem:[#allocation5 + $0x8] sm:$0xff]  }
  0x27   :  { %192 = vmatprep.subr.bf16.mxu0 %v306_v0  ;;  %208 = vmatprep.mubr.msk.bf16.mxu0 %vm307_vm0, %v306_v0  ;;  %v223_v3 = vld [vmem:[#allocation5 + $0x10] sm:$0xff]   ;;  %v224_v4 = vld [vmem:[#allocation5 + $0x18] sm:$0xff]   ;;  %v225_v5 = vld [vmem:[#allocation5 + $0x20] sm:$0xff]   ;;  %s308_s1 = smov [#allocation7]  }
  0x28   :  { %193 = vmatpush3.bf16.msra.mxu0 %v221_v1  ;;  %v226_v6 = vld [vmem:[#allocation5 + $0x28] sm:$0xff]   ;;  %v227_v7 = vld [vmem:[#allocation5 + $0x30] sm:$0xff]   ;;  %v228_v8 = vld [vmem:[#allocation5 + $0x38] sm:$0xff]   ;;  %s161_s6 = sshll.u32 %s308_s1, 4  ;;  %s162_s6 = int_to_ptr.vmem [resolvable:$true] %s161_s6 }
  0x29   :  { %194 = vmatprep.subr.bf16.mxu0 %v306_v0  ;;  %v229_v9 = vld [vmem:[#allocation2] sm:$0xff]   ;;  %s274_s7 = scalar_lea.vmem %s162_s6, 256  ;;  %p279_p3 = scmp.lt.s32.totalorder %s162_s6, %s162_s6 }
  0x2a   :  { %p275_p2 = scmp.ne.s32.totalorder %s162_s6, %s274_s7  ;;  %p280_p4 = scmp.lt.s32.totalorder %s274_s7, %s274_s7 }
  0x2c   :  { %195 = vmatpush3.bf16.msra.mxu0 %v222_v2  ;;  %p281_p5 = por %p280_p4, %p279_p3 }
  0x2d   :  { %196 = vmatprep.subr.bf16.mxu0 %v306_v0 }
  0x2e   :  { %p282_p6 = pnand %p281_p5, %p275_p2 }
  0x30   :  { %197 = vmatpush3.bf16.msra.mxu0 %v223_v3 }
  0x31   :  { %198 = vmatprep.subr.bf16.mxu0 %v306_v0 }
  0x34   :  { %199 = vmatpush3.bf16.msra.mxu0 %v224_v4 }
  0x35   :  { %200 = vmatprep.subr.bf16.mxu0 %v306_v0 }
  0x38   :  { %201 = vmatpush3.bf16.msra.mxu0 %v225_v5 }
  0x39   :  { %202 = vmatprep.subr.bf16.mxu0 %v306_v0 }
  0x3c   :  { %203 = vmatpush3.bf16.msra.mxu0 %v226_v6 }
  0x3d   :  { %204 = vmatprep.subr.bf16.mxu0 %v306_v0 }
  0x40   :  { %205 = vmatpush3.bf16.msra.mxu0 %v227_v7 }
  0x41   :  { %206 = vmatprep.subr.bf16.mxu0 %v306_v0 }
  0x44   :  { %207 = vmatpush3.bf16.msra.mxu0 %v228_v8 }
  0x47   :  { %209 = vmatmul.mubr.bf16.vlgmr.msra.gmra.mrb[0].mxu0 %v229_v9 }
 0x11a   :  { %v147_v10 = vpop.f32.mrb[0].mxu0 }
 0x11b   :  { %154 = vst [vmem:[#allocation7] sm:$0xff] %v147_v10  ;;  %v210_v11 = vpop.f32.mrb[1].mxu0 }
 0x11c   :  { %v150_v12 = vpop.f32.mrb[2].mxu0 }
 0x11d   :  { %155 = vst [vmem:[#allocation7 + $0x8] sm:$0xff] %v150_v12  ;;  %v211_v13 = vpop.f32.mrb[3].mxu0 }
 0x11e   :  { %285 = shalt.err (!%p282_p6)
}
 0x11f   :  { %s286_s10 = scalar_lea.hbm %s364_s2, 256 }
 0x120   :  { %p287_p7 = scmp.ne.s32.totalorder %s364_s2, %s286_s10  ;;  %p290_p8 = scmp.lt.u32.totalorder %s286_s10, %s364_s2 }
 0x122   :  { %p292_p9 = pnand %p290_p8, %p287_p7 }
 0x124   :  { %295 = shalt.err (!%p292_p9)
}
 0x125   :  { %s309_s15 = smov 128   ;;  %s310_s16 = smov 8  }
 0x126   :  { %167 = dma.vmem_to_hbm [thread:$0]  %s162_s6, 256, %s364_s2, [#allocation4], %s309_s15, %s309_s15, %s310_s16  }
 0x127   :  { %300 = dma.done.wait [#allocation4], 256  }
 0x128   :  { %301 = vsyncadd [#allocation4], 4294967040 }
 0x129   :  { %171 = vsyncpa [#allocation3], 1 }
 0x12a   :  { %172 = vsyncpa [#allocation6], 1 }
 0x12b   :  { %173 = vsyncpa [#allocation4], 1 }

</bundles_post_ra>
